<compile_context>
chip_gen: v7x
topology: tpu7x:2x2x1
jax: 0.10.0
libtpu: 0.0.40
codegen_flags: <defaults>
</compile_context>

<pallas_src>
import functools

import jax
import jax.numpy as jnp
from jax import lax
from jax.experimental import pallas as pl
from jax.experimental.pallas import tpu as pltpu

D_MODEL = 32
D_HIDDEN = 4 * D_MODEL   # 128
_CHUNK = 1024            # rows per inner step: caps hidden-activation VMEM use
_LANE = 128              # VMEM lane width (32-wide blocks pad to this)


def _round_up(x: int, m: int) -> int:
    return ((x + m - 1) // m) * m


def _ffn_kernel(x_ref, w1_ref, b1_ref, w2_ref, b2_ref, o_ref, *, chunk, n_chunks):
    # x_ref:  (TILE_M, 32)   native dtype (f32 here)
    # w1_ref: (32, 128) bf16    b1_ref: (1, 128) f32
    # w2_ref: (128, 32) bf16    b2_ref: (1, 32)  f32
    # o_ref:  (TILE_M, 32)   out dtype
    w1 = w1_ref[...]
    w2 = w2_ref[...]
    b1 = b1_ref[...]
    b2 = b2_ref[...]

    def compute(xc):
        # bf16 x bf16 MXU matmuls, f32 accumulation / bias / ReLU.
        h = jnp.dot(xc.astype(jnp.bfloat16), w1,
                    preferred_element_type=jnp.float32)
        h = jnp.maximum(h + b1, 0.0)
        out = jnp.dot(h.astype(jnp.bfloat16), w2,
                      preferred_element_type=jnp.float32) + b2
        return out.astype(o_ref.dtype)

    if n_chunks == 1:
        o_ref[...] = compute(x_ref[...])
    else:
        def body(c, carry):
            start = pl.multiple_of(c * chunk, chunk)
            o_ref[pl.ds(start, chunk), :] = compute(x_ref[pl.ds(start, chunk), :])
            return carry
        lax.fori_loop(0, n_chunks, body, 0, unroll=2)


@functools.partial(jax.jit, static_argnames=("tile_m",))
def feed_forward(x, w1, b1, w2, b2, *, tile_m=16384):
    """x: (B, T, d_model) -> (B, T, d_model); matches nn.Sequential(Linear, ReLU, Linear)."""
    B, T, D = x.shape
    assert D == D_MODEL
    assert tile_m % _CHUNK == 0 and tile_m >= _CHUNK
    out_dtype = x.dtype
    M = B * T

    # Tile/chunk selection.
    if M > _CHUNK:
        # Cap the tile near M/2 (chunk-aligned) so the grid has >=2 steps and
        # the "parallel" axis can be sharded across both TCs on v7x.
        tm = min(tile_m, _round_up((M + 1) // 2, _CHUNK))
        chunk = _CHUNK
    else:
        tm = _round_up(M, 8)   # sublane rule on the block shape
        chunk = tm
    n_chunks = tm // chunk
    grid = (pl.cdiv(M, tm),)   # partial last block handled by Pallas masking

    # Free reshape; NO dtype cast and NO padding of the activations.
    x2d = x.reshape(M, D)
    w1c = w1.astype(jnp.bfloat16)
    w2c = w2.astype(jnp.bfloat16)
    b1_2d = b1.reshape(1, D_HIDDEN).astype(jnp.float32)
    b2_2d = b2.reshape(1, D_MODEL).astype(jnp.float32)

    itemsize_x = jnp.dtype(x.dtype).itemsize
    itemsize_o = jnp.dtype(out_dtype).itemsize

    # VMEM budget: 32-wide x/out blocks are lane-padded to 128 and
    # double-buffered by the Pallas pipeline; hidden activation is per-chunk.
    vmem_bytes = (2 * tm * _LANE * itemsize_x          # x double buffer
                  + 2 * tm * _LANE * itemsize_o        # out double buffer
                  + chunk * D_HIDDEN * (4 + 2)         # h f32 + h bf16
                  + chunk * _LANE * 2                  # bf16 copy of x chunk
                  + 2 * 2 * (w1c.size + w2c.size)      # resident bf16 weights
                  + 2 * 4 * (2 * _LANE))               # biases (lane padded)
    vmem_limit = min(int(vmem_bytes * 1.25) + (2 << 20), 100 << 20)

    cost = pl.CostEstimate(
        flops=4 * M * D_MODEL * D_HIDDEN,  # two matmuls, 2 flops per MAC
        transcendentals=0,
        bytes_accessed=(M * D_MODEL * (itemsize_x + itemsize_o)
                        + (w1c.size + w2c.size) * 2
                        + (b1_2d.size + b2_2d.size) * 4),
    )

    kernel = functools.partial(_ffn_kernel, chunk=chunk, n_chunks=n_chunks)

    out2d = pl.pallas_call(
        kernel,
        out_shape=jax.ShapeDtypeStruct((M, D_MODEL), out_dtype),
        grid=grid,
        in_specs=[
            pl.BlockSpec((tm, D_MODEL), lambda i: (i, 0)),        # x: tiled over M
            pl.BlockSpec((D_MODEL, D_HIDDEN), lambda i: (0, 0)),  # w1: resident
            pl.BlockSpec((1, D_HIDDEN), lambda i: (0, 0)),        # b1: resident
            pl.BlockSpec((D_HIDDEN, D_MODEL), lambda i: (0, 0)),  # w2: resident
            pl.BlockSpec((1, D_MODEL), lambda i: (0, 0)),         # b2: resident
        ],
        out_specs=pl.BlockSpec((tm, D_MODEL), lambda i: (i, 0)),
        compiler_params=pltpu.CompilerParams(
            dimension_semantics=("parallel",),   # shard M across TCs on v7x
            vmem_limit_bytes=vmem_limit,
        ),
        cost_estimate=cost,
    )(x2d, w1c, b1_2d, w2c, b2_2d)

    return out2d.reshape(B, T, D)


def init_params(key):
    """Deterministic init matching nn.Linear shapes (stored transposed: (in, out))."""
    k1, k2, k3, k4 = jax.random.split(key, 4)
    lim1 = 1.0 / jnp.sqrt(D_MODEL)
    lim2 = 1.0 / jnp.sqrt(D_HIDDEN)
    w1 = jax.random.uniform(k1, (D_MODEL, D_HIDDEN), jnp.float32, -lim1, lim1)
    b1 = jax.random.uniform(k2, (D_HIDDEN,), jnp.float32, -lim1, lim1)
    w2 = jax.random.uniform(k3, (D_HIDDEN, D_MODEL), jnp.float32, -lim2, lim2)
    b2 = jax.random.uniform(k4, (D_MODEL,), jnp.float32, -lim2, lim2)
    return w1, b1, w2, b2


if __name__ == "__main__":
    key = jax.random.PRNGKey(0)
    kx, kp = jax.random.split(key)

    B, T = 2, 8  # batch=2, seq=8, d_model=32
    x = jax.random.normal(kx, (B, T, D_MODEL), jnp.float32)
    w1, b1, w2, b2 = init_params(kp)

    out = feed_forward(x, w1, b1, w2, b2)
    out = jax.block_until_ready(out)
    assert out.shape == (B, T, D_MODEL)
    assert out.dtype == x.dtype

    # Reference mirroring the kernel's bf16-matmul / f32-accumulate numerics.
    xb = x.reshape(-1, D_MODEL).astype(jnp.bfloat16).astype(jnp.float32)
    w1b = w1.astype(jnp.bfloat16).astype(jnp.float32)
    w2b = w2.astype(jnp.bfloat16).astype(jnp.float32)
    h = jnp.maximum(jnp.dot(xb, w1b, precision="highest") + b1, 0.0)
    hb = h.astype(jnp.bfloat16).astype(jnp.float32)
    ref = (jnp.dot(hb, w2b, precision="highest") + b2).reshape(B, T, D_MODEL)
    assert jnp.allclose(out, ref, atol=1e-4, rtol=1e-4)

    # Loose sanity check against the pure-f32 math of the PyTorch module.
    ref_f32 = jnp.maximum(x @ w1 + b1, 0.0) @ w2 + b2
    assert jnp.allclose(out, ref_f32, atol=5e-2, rtol=5e-2)

    print("KERNEL_OK")
</pallas_src>

<mosaic_0001>
module attributes {stable_mosaic.version = 11 : i64} {
  func.func @_ffn_kernel(%arg0: i32, %arg1: memref<16x32xf32, #tpu.memory_space<vmem>>, %arg2: memref<32x128xbf16, #tpu.memory_space<vmem>>, %arg3: memref<1x128xf32, #tpu.memory_space<vmem>>, %arg4: memref<128x32xbf16, #tpu.memory_space<vmem>>, %arg5: memref<1x32xf32, #tpu.memory_space<vmem>>, %arg6: memref<16x32xf32, #tpu.memory_space<vmem>>) attributes {dimension_semantics = [#tpu.dimension_semantics<parallel>], iteration_bounds = array<i64: 1>, scalar_prefetch = 0 : i64, scratch_operands = 0 : i64, tpu.core_type = #tpu.core_type<tc>, window_params = [{transform_indices = @transform_0, window_bounds = array<i64: 16, 32>}, {pipeline_mode = #tpu.pipeline_mode<synchronous>, transform_indices = @transform_1, window_bounds = array<i64: 32, 128>}, {pipeline_mode = #tpu.pipeline_mode<synchronous>, transform_indices = @transform_2, window_bounds = array<i64: 1, 128>}, {pipeline_mode = #tpu.pipeline_mode<synchronous>, transform_indices = @transform_3, window_bounds = array<i64: 128, 32>}, {pipeline_mode = #tpu.pipeline_mode<synchronous>, transform_indices = @transform_4, window_bounds = array<i64: 1, 32>}, {transform_indices = @transform_5, window_bounds = array<i64: 16, 32>}]} {
    %c0 = arith.constant 0 : index
    %c0_0 = arith.constant 0 : index
    %0 = vector.load %arg2[%c0, %c0_0] : memref<32x128xbf16, #tpu.memory_space<vmem>>, vector<32x128xbf16>
    %c0_1 = arith.constant 0 : index
    %c0_2 = arith.constant 0 : index
    %1 = vector.load %arg4[%c0_1, %c0_2] : memref<128x32xbf16, #tpu.memory_space<vmem>>, vector<128x32xbf16>
    %c0_3 = arith.constant 0 : index
    %c0_4 = arith.constant 0 : index
    %2 = vector.load %arg3[%c0_3, %c0_4] : memref<1x128xf32, #tpu.memory_space<vmem>>, vector<1x128xf32>
    %c0_5 = arith.constant 0 : index
    %c0_6 = arith.constant 0 : index
    %3 = vector.load %arg5[%c0_5, %c0_6] : memref<1x32xf32, #tpu.memory_space<vmem>>, vector<1x32xf32>
    %c0_7 = arith.constant 0 : index
    %c0_8 = arith.constant 0 : index
    %4 = vector.load %arg1[%c0_7, %c0_8] : memref<16x32xf32, #tpu.memory_space<vmem>>, vector<16x32xf32>
    %5 = arith.truncf %4 : vector<16x32xf32> to vector<16x32xbf16>
    %cst = arith.constant dense<0.000000e+00> : vector<16x128xf32>
    %6 = tpu.matmul %5, %0, %cst {dimension_numbers = #tpu.dot_dimension_numbers<[1], [0], [0], [1], [0, 0, 1, 1], [], []>} : vector<16x32xbf16>, vector<32x128xbf16>, vector<16x128xf32> -> vector<16x128xf32>
    %7 = vector.broadcast %2 : vector<1x128xf32> to vector<16x128xf32>
    %8 = arith.addf %6, %7 : vector<16x128xf32>
    %cst_9 = arith.constant 0.000000e+00 : f32
    %9 = vector.broadcast %cst_9 : f32 to vector<16x128xf32>
    %10 = arith.maximumf %8, %9 : vector<16x128xf32>
    %11 = arith.truncf %10 : vector<16x128xf32> to vector<16x128xbf16>
    %cst_10 = arith.constant dense<0.000000e+00> : vector<16x32xf32>
    %12 = tpu.matmul %11, %1, %cst_10 {dimension_numbers = #tpu.dot_dimension_numbers<[1], [0], [0], [1], [0, 0, 1, 1], [], []>} : vector<16x128xbf16>, vector<128x32xbf16>, vector<16x32xf32> -> vector<16x32xf32>
    %13 = vector.broadcast %3 : vector<1x32xf32> to vector<16x32xf32>
    %14 = arith.addf %12, %13 : vector<16x32xf32>
    %c0_11 = arith.constant 0 : index
    %c0_12 = arith.constant 0 : index
    %15 = vector.load %arg6[%c0_11, %c0_12] : memref<16x32xf32, #tpu.memory_space<vmem>>, vector<16x32xf32>
    tpu.vector_store %arg6[%c0_11, %c0_12], %14 {strides = array<i32>} : memref<16x32xf32, #tpu.memory_space<vmem>>, vector<16x32xf32>,
    return
  }
  func.func @transform_0(%arg0: i32) -> (i32, i32) {
    %c0_i32 = arith.constant 0 : i32
    %c0_i32_0 = arith.constant 0 : i32
    return %arg0, %c0_i32 : i32, i32
  }
  func.func @transform_1(%arg0: i32) -> (i32, i32) {
    %c0_i32 = arith.constant 0 : i32
    %c0_i32_0 = arith.constant 0 : i32
    %c0_i32_1 = arith.constant 0 : i32
    return %c0_i32, %c0_i32_0 : i32, i32
  }
  func.func @transform_2(%arg0: i32) -> (i32, i32) {
    %c0_i32 = arith.constant 0 : i32
    %c0_i32_0 = arith.constant 0 : i32
    %c0_i32_1 = arith.constant 0 : i32
    return %c0_i32, %c0_i32_0 : i32, i32
  }
  func.func @transform_3(%arg0: i32) -> (i32, i32) {
    %c0_i32 = arith.constant 0 : i32
    %c0_i32_0 = arith.constant 0 : i32
    %c0_i32_1 = arith.constant 0 : i32
    return %c0_i32, %c0_i32_0 : i32, i32
  }
  func.func @transform_4(%arg0: i32) -> (i32, i32) {
    %c0_i32 = arith.constant 0 : i32
    %c0_i32_0 = arith.constant 0 : i32
    %c0_i32_1 = arith.constant 0 : i32
    return %c0_i32, %c0_i32_0 : i32, i32
  }
  func.func @transform_5(%arg0: i32) -> (i32, i32) {
    %c0_i32 = arith.constant 0 : i32
    %c0_i32_0 = arith.constant 0 : i32
    return %arg0, %c0_i32 : i32, i32
  }
}

</mosaic_0001>

<bundles_post_ra>
// kernel: feed_forward.1
= control target key start
LH: loop header
LB: loop body
LE: loop exit
PB: predicated region body
PF: predicated region fallthrough
CT: control target
= control target key end

     0   :  { %v318_v1 = vmov 0.0   ;;  %vm319_vm0 = vmmov 0   ;;  %vm65_vm1 = vcmask 261120   ;;  %s410_s0 = inlined_call_operand.vmem [shape: f32[16,32], index: 0, kind: input, shape index: {}]   ;;  %s411_s1 = inlined_call_operand.vmem [shape: bf16[32,128], index: 1, kind: input, shape index: {}]   ;;  %s412_s2 = inlined_call_operand.vmem [shape: f32[1,128], index: 2, kind: input, shape index: {}]   ;;  %s413_s3 = inlined_call_operand.vmem [shape: bf16[128,32], index: 3, kind: input, shape index: {}]   ;;  %s414_s4 = inlined_call_operand.vmem [shape: f32[1,32], index: 4, kind: input, shape index: {}]   ;;  %s415_s5 = inlined_call_operand.hbm [shape: f32[16,32], index: 5, kind: output, shape index: {}]  }
   0x1   :  { %v284_v0 = vld [vmem:[%s411_s1] sm:$0xff]   ;;  %251 = vmatprep.subr.bf16.mxu0 %v318_v1  ;;  %v285_v2 = vld [vmem:[%s411_s1 + $0x8] sm:$0xff]   ;;  %259 = vmatprep.subr.bf16.mxu1 %v318_v1  ;;  %v288_v8 = vld [vmem:[%s413_s3 + $0x10] sm:$0xff]  }
   0x2   :  { %252 = vmatpush3.bf16.msra.mxu0 %v284_v0  ;;  %255 = vmatprep.mubr.msk.bf16.mxu0 %vm319_vm0, %v318_v1  ;;  %v44_v3 = vld [vmem:[%s410_s0] sm:$0xff]  ;;  %v45_v4 = vld [vmem:[%s410_s0 + $0x8] sm:$0xff] }
   0x3   :  { %253 = vmatprep.subr.bf16.mxu0 %v318_v1  ;;  %v286_v5 = vld [vmem:[%s413_s3] sm:$0xff]   ;;  %275 = vmatprep.mubr.msk.bf16.mxu1 %vm319_vm0, %v318_v1  ;;  %v46_v6 = vpack.c.bf16 %v45_v4, %v44_v3  ;;  %v287_v7 = vld [vmem:[%s413_s3 + $0x8] sm:$0xff]  }
   0x4   :  { %260 = vmatpush3.bf16.msra.mxu1 %v286_v5 }
   0x5   :  { %261 = vmatprep.subr.bf16.mxu1 %v318_v1 }
   0x6   :  { %254 = vmatpush3.bf16.msra.mxu0 %v285_v2 }
   0x8   :  { %262 = vmatpush3.bf16.msra.mxu1 %v287_v7 }
   0x9   :  { %256 = vmatmul.mubr.msk.bf16.vlgmr.msra.gmra.mrb[0].mxu0 %vm65_vm1, %v46_v6  ;;  %263 = vmatprep.subr.bf16.mxu1 %v318_v1 }
   0xa   :  { %10 = vsyncpa [#allocation3], 0  ;;  %v289_v9 = vld [vmem:[%s413_s3 + $0x18] sm:$0xff]   ;;  %v290_v10 = vld [vmem:[%s413_s3 + $0x20] sm:$0xff]  }
   0xb   :  { %v291_v11 = vld [vmem:[%s413_s3 + $0x28] sm:$0xff]   ;;  %v292_v12 = vld [vmem:[%s413_s3 + $0x30] sm:$0xff]   ;;  %v293_v13 = vld [vmem:[%s413_s3 + $0x38] sm:$0xff]   ;;  %s320_s3 = smov [#allocation2]  }
   0xc   :  { %264 = vmatpush3.bf16.msra.mxu1 %v288_v8  ;;  %v226_v14 = vld [vmem:[%s412_s2] ss:$0 sm:$0xff]  ;;  %s215_s19 = sshll.u32 %s320_s3, 4  ;;  %s216_s19 = int_to_ptr.vmem [resolvable:$true] %s215_s19 }
   0xd   :  { %265 = vmatprep.subr.bf16.mxu1 %v318_v1  ;;  %v230_v24 = vld [vmem:[%s414_s4] ss:$0 sm:$0xff]  ;;  %s294_s2 = scalar_lea.vmem %s216_s19, 256  ;;  %p299_p1 = scmp.lt.s32.totalorder %s216_s19, %s216_s19 }
   0xe   :  { %p295_p0 = scmp.ne.s32.totalorder %s216_s19, %s294_s2  ;;  %p300_p2 = scmp.lt.s32.totalorder %s294_s2, %s294_s2 }
  0x10   :  { %266 = vmatpush3.bf16.msra.mxu1 %v289_v9  ;;  %p301_p3 = por %p300_p2, %p299_p1 }
  0x11   :  { %267 = vmatprep.subr.bf16.mxu1 %v318_v1 }
  0x12   :  { %p302_p4 = pnand %p301_p3, %p295_p0 }
  0x14   :  { %268 = vmatpush3.bf16.msra.mxu1 %v290_v10 }
  0x15   :  { %269 = vmatprep.subr.bf16.mxu1 %v318_v1 }
  0x18   :  { %270 = vmatpush3.bf16.msra.mxu1 %v291_v11 }
  0x19   :  { %271 = vmatprep.subr.bf16.mxu1 %v318_v1 }
  0x1c   :  { %272 = vmatpush3.bf16.msra.mxu1 %v292_v12 }
  0x1d   :  { %273 = vmatprep.subr.bf16.mxu1 %v318_v1 }
  0x20   :  { %274 = vmatpush3.bf16.msra.mxu1 %v293_v13 }
  0xdc   :  { %v103_v15 = vpop.f32.mrb[0].mxu0 }
  0xdd   :  { %v104_v16 = vadd.f32 %v226_v14, %v103_v15  ;;  %v257_v17 = vpop.f32.mrb[1].mxu0 }
  0xde   :  { %v106_v18 = vpop.f32.mrb[2].mxu0 }
  0xdf   :  { %v107_v19 = vadd.f32 %v226_v14, %v106_v18  ;;  %v258_v20 = vpop.f32.mrb[3].mxu0  ;;  %v110_v21 = vmax.f32 %v104_v16, 0.0 }
  0xe1   :  { %v111_v22 = vmax.f32 %v107_v19, 0.0 }
  0xe3   :  { %v112_v23 = vpack.c.bf16 %v111_v22, %v110_v21 }
  0xe5   :  { %276 = vmatmul.mubr.bf16.vlgmr.msra.gmra.mrb[0].mxu1 %v112_v23 }
 0x1b8   :  { %v201_v25 = vpop.f32.mrb[0].mxu1 }
 0x1b9   :  { %v202_v26 = vadd.f32 %v230_v24, %v201_v25  ;;  %v277_v27 = vpop.f32.mrb[1].mxu1 }
 0x1ba   :  { %v204_v28 = vpop.f32.mrb[2].mxu1 }
 0x1bb   :  { %208 = vst.msk [vmem:[#allocation2] sm:$0xff] %vm65_vm1, %v202_v26  ;;  %v205_v29 = vadd.f32 %v230_v24, %v204_v28  ;;  %v278_v30 = vpop.f32.mrb[3].mxu1 }
 0x1bd   :  { %209 = vst.msk [vmem:[#allocation2 + $0x8] sm:$0xff] %vm65_vm1, %v205_v29 }
 0x1be   :  { %305 = shalt.err (!%p302_p4)
}
 0x1bf   :  { %s306_s21 = scalar_lea.hbm %s415_s5, 256 }
 0x1c0   :  { %p307_p5 = scmp.ne.s32.totalorder %s415_s5, %s306_s21  ;;  %p310_p6 = scmp.lt.u32.totalorder %s306_s21, %s415_s5 }
 0x1c2   :  { %p312_p7 = pnand %p310_p6, %p307_p5 }
 0x1c4   :  { %315 = shalt.err (!%p312_p7)
}
 0x1c5   :  { %s321_s26 = smov 128   ;;  %s322_s27 = smov 8  }
 0x1c6   :  { %221 = dma.vmem_to_hbm [thread:$0]  %s216_s19, 256, %s415_s5, [#allocation3], %s321_s26, %s321_s26, %s322_s27  }
 0x1c7   :  { %316 = dma.done.wait [#allocation3], 256  }
 0x1c8   :  { %317 = vsyncadd [#allocation3], 4294967040 }
 0x1c9   :  { %225 = vsyncpa [#allocation3], 1 }

</bundles_post_ra>
